<compile_context>
chip_gen: v5e
topology: v5e:2x2
jax: 0.10.0
libtpu: 0.0.40
codegen_flags: <defaults>
</compile_context>

<pallas_src>
import math
import warnings
from functools import partial

import jax
import jax.numpy as jnp
from jax.experimental import pallas as pl
from jax.experimental.pallas import tpu as pltpu

# Donation is intentional (PyTorch in-place semantics); silence the benign warning if
# XLA cannot alias the donated buffer on the padded fallback path.
warnings.filterwarnings("ignore", message="Some donated buffers were not usable")

_LANE = 128
_SUBLANE = 8


def _add_pos_kernel(x_ref, pos_ref, o_ref):
    # x_ref / o_ref: (Bb, Sb, 128) blocks; pos_ref: (1, Sb, 128), broadcast over batch.
    o_ref[...] = (
        x_ref[...].astype(jnp.float32) + pos_ref[...].astype(jnp.float32)
    ).astype(o_ref.dtype)


def _tpu_vmem_config():
    """Returns (vmem_limit_bytes, working_set_budget_bytes), gated on TPU generation."""
    try:
        info = pltpu.get_tpu_info()
        cap = getattr(info, "vmem_capacity_bytes", None) or (64 * 1024 * 1024)
    except Exception:
        cap = 64 * 1024 * 1024  # conservative: assume v7x-sized VMEM
    if cap >= 100 * 1024 * 1024:
        # v5e / v6e: 128 MiB physical VMEM -> big blocks amortize per-step overhead.
        return 64 * 1024 * 1024, 48 * 1024 * 1024
    # v7x: 64 MiB physical VMEM per TensorCore -> leave headroom.
    return 48 * 1024 * 1024, 36 * 1024 * 1024


@partial(jax.jit, donate_argnums=(0,))
def absolute_positional_encoding(x, pos_embed):
    """x: (B, L, H), pos_embed: (1, L, H) -> (B, L, H) = x + pos_embed (broadcast over B).

    x is donated (updated in place), matching PyTorch's `x += pos_embed`.
    """
    B, L, H = x.shape
    assert pos_embed.shape == (1, L, H)
    LH = L * H

    vmem_limit, ws_budget = _tpu_vmem_config()

    # Lane/sublane-dense view: (B, L, H) -> (B, S, 128), a bitcast reshape (row-major)
    # when L*H % 128 == 0.
    LH_pad = pl.cdiv(LH, _LANE) * _LANE
    S = LH_pad // _LANE
    if LH_pad == LH:
        xr = x.reshape(B, S, _LANE)
        pr = pos_embed.reshape(1, S, _LANE)
    else:
        # TODO(synk): padding costs one extra HBM pass over x; real models have
        # L*H % 128 == 0 and take the zero-copy bitcast path above.
        pad = ((0, 0), (0, 0), (0, LH_pad - LH))
        xr = jnp.pad(x.reshape(B, 1, LH), pad).reshape(B, S, _LANE)
        pr = jnp.pad(pos_embed.reshape(1, 1, LH), pad).reshape(1, S, _LANE)

    # Batch block: cover the whole (small) batch per step, else tile by 8.
    Bb = B if B <= 8 else 8

    # Sublane block Sb (multiple of 8, or full S), sized so the double-buffered working
    # set 2 x (x_block + pos_block + out_block) fits the per-generation budget.
    x_it = x.dtype.itemsize
    p_it = pos_embed.dtype.itemsize
    row_bytes = _LANE * (Bb * x_it + p_it + Bb * x_it)  # x + pos + out per sublane row
    sb = max(_SUBLANE, (ws_budget // (2 * row_bytes)) // _SUBLANE * _SUBLANE)
    Sb = S if sb >= S else sb
    nc = pl.cdiv(S, Sb)
    nb = pl.cdiv(B, Bb)

    # v7x has 2 TensorCores per chip: make sure the parallel grid has >= 2 steps so the
    # megacore sharder can use both (negligible cost on single-TC v5e/v6e).
    if nc * nb == 1 and B >= 2:
        Bb = pl.cdiv(B, 2)
        nb = pl.cdiv(B, Bb)

    out = pl.pallas_call(
        _add_pos_kernel,
        out_shape=jax.ShapeDtypeStruct((B, S, _LANE), x.dtype),
        grid_spec=pltpu.PrefetchScalarGridSpec(
            num_scalar_prefetch=0,
            # Chunk axis OUTER, batch axis INNER -> the positional chunk keeps the same
            # block index across the inner loop and stays VMEM-resident (no re-DMA).
            grid=(nc, nb),
            in_specs=[
                pl.BlockSpec((Bb, Sb, _LANE), lambda c, b: (b, c, 0)),  # x
                pl.BlockSpec((1, Sb, _LANE), lambda c, b: (0, c, 0)),   # pos (reused)
            ],
            out_specs=pl.BlockSpec((Bb, Sb, _LANE), lambda c, b: (b, c, 0)),
        ),
        compiler_params=pltpu.CompilerParams(
            dimension_semantics=("parallel", "parallel"),
            vmem_limit_bytes=vmem_limit,
        ),
        input_output_aliases={0: 0},  # in-place update of x, matching `x += pos_embed`
    )(xr, pr)

    if LH_pad == LH:
        return out.reshape(B, L, H)
    return out.reshape(B, 1, LH_pad)[:, 0, :LH].reshape(B, L, H)


def init_pos_embed(key, max_len: int, hidden_size: int, dtype=jnp.float32):
    """Deterministic stand-in for nn.init.kaiming_normal_ on a (1, max_len, hidden) tensor.

    PyTorch fan_in for a 3D tensor (1, max_len, hidden) = max_len * hidden,
    gain = sqrt(2) (leaky_relu default, a=0), std = gain / sqrt(fan_in).
    """
    fan_in = max_len * hidden_size
    std = math.sqrt(2.0) / math.sqrt(fan_in)
    return (
        jax.random.normal(key, (1, max_len, hidden_size), dtype=jnp.float32) * std
    ).astype(dtype)


if __name__ == "__main__":
    key = jax.random.PRNGKey(0)
    kx, kp, kx2 = jax.random.split(key, 3)

    # Case 1: the module's toy shape, f32 (L*H = 256 -> two sublane rows of 128 lanes).
    B, max_len, hidden_size = 2, 8, 32
    x = jax.random.normal(kx, (B, max_len, hidden_size), dtype=jnp.float32)
    pos_embed = init_pos_embed(kp, max_len, hidden_size)
    ref = x + pos_embed  # broadcasts over batch, like pos_embed.expand(B, -1, -1)

    # Prepare case 2 inputs BEFORE case 1 runs: x is donated (in-place semantics).
    xb = x.astype(jnp.bfloat16)
    refb = (xb.astype(jnp.float32) + pos_embed).astype(jnp.bfloat16)

    out = jax.block_until_ready(absolute_positional_encoding(x, pos_embed))
    assert out.shape == (B, max_len, hidden_size)
    assert jnp.allclose(out, ref, atol=1e-6, rtol=1e-6)

    # Case 2: bf16 activations + f32 positional table (mixed-dtype budgeting path).
    outb = jax.block_until_ready(absolute_positional_encoding(xb, pos_embed))
    assert outb.dtype == jnp.bfloat16
    assert jnp.allclose(
        outb.astype(jnp.float32), refb.astype(jnp.float32), atol=1e-2, rtol=1e-2
    )

    # Case 3: L*H = 320 not a multiple of 128 -> exercises the padded fallback path.
    B3, L3, H3 = 2, 8, 40
    x3 = jax.random.normal(kx2, (B3, L3, H3), dtype=jnp.float32)
    pos3 = init_pos_embed(kp, L3, H3)
    ref3 = x3 + pos3
    out3 = jax.block_until_ready(absolute_positional_encoding(x3, pos3))
    assert jnp.allclose(out3, ref3, atol=1e-6, rtol=1e-6)

    print("KERNEL_OK")
</pallas_src>

<mosaic_0001>
module attributes {stable_mosaic.version = 11 : i64} {
  func.func @_add_pos_kernel(%arg0: i32, %arg1: i32, %arg2: memref<1x2x128xf32, #tpu.memory_space<vmem>>, %arg3: memref<1x2x128xf32, #tpu.memory_space<vmem>>, %arg4: memref<1x2x128xf32, #tpu.memory_space<vmem>>) attributes {dimension_semantics = [#tpu.dimension_semantics<parallel>, #tpu.dimension_semantics<parallel>], iteration_bounds = array<i64: 1, 2>, scalar_prefetch = 0 : i64, scratch_operands = 0 : i64, tpu.core_type = #tpu.core_type<tc>, window_params = [{transform_indices = @transform_0, window_bounds = array<i64: 1, 2, 128>}, {transform_indices = @transform_1, window_bounds = array<i64: 1, 2, 128>}, {transform_indices = @transform_2, window_bounds = array<i64: 1, 2, 128>}]} {
    %c0 = arith.constant 0 : index
    %c0_0 = arith.constant 0 : index
    %c0_1 = arith.constant 0 : index
    %0 = vector.load %arg2[%c0, %c0_0, %c0_1] : memref<1x2x128xf32, #tpu.memory_space<vmem>>, vector<1x2x128xf32>
    %c0_2 = arith.constant 0 : index
    %c0_3 = arith.constant 0 : index
    %c0_4 = arith.constant 0 : index
    %1 = vector.load %arg3[%c0_2, %c0_3, %c0_4] : memref<1x2x128xf32, #tpu.memory_space<vmem>>, vector<1x2x128xf32>
    %2 = arith.addf %0, %1 : vector<1x2x128xf32>
    %c0_5 = arith.constant 0 : index
    %c0_6 = arith.constant 0 : index
    %c0_7 = arith.constant 0 : index
    %3 = vector.load %arg4[%c0_5, %c0_6, %c0_7] : memref<1x2x128xf32, #tpu.memory_space<vmem>>, vector<1x2x128xf32>
    tpu.vector_store %arg4[%c0_5, %c0_6, %c0_7], %2 {strides = array<i32>} : memref<1x2x128xf32, #tpu.memory_space<vmem>>, vector<1x2x128xf32>,
    return
  }
  func.func @transform_0(%arg0: i32, %arg1: i32) -> (i32, i32, i32) {
    %c0_i32 = arith.constant 0 : i32
    %c0_i32_0 = arith.constant 0 : i32
    return %arg1, %arg0, %c0_i32 : i32, i32, i32
  }
  func.func @transform_1(%arg0: i32, %arg1: i32) -> (i32, i32, i32) {
    %c0_i32 = arith.constant 0 : i32
    %c0_i32_0 = arith.constant 0 : i32
    %c0_i32_1 = arith.constant 0 : i32
    return %c0_i32, %arg0, %c0_i32_0 : i32, i32, i32
  }
  func.func @transform_2(%arg0: i32, %arg1: i32) -> (i32, i32, i32) {
    %c0_i32 = arith.constant 0 : i32
    %c0_i32_0 = arith.constant 0 : i32
    return %arg1, %arg0, %c0_i32 : i32, i32, i32
  }
}

</mosaic_0001>

<bundles_post_ra>
// kernel: absolute_positional_encoding.1
= control target key start
LH: loop header
LB: loop body
LE: loop exit
PB: predicated region body
PF: predicated region fallthrough
CT: control target
= control target key end

     0   :  { %s354_s9 = smov 0   ;;  %s331_s10 = smov 0   ;;  %s368_s0 = inlined_call_operand.vmem [shape: f32[2,2,128], index: 0, kind: input, shape index: {}, may-alias: {0,2}]   ;;  %s369_s1 = inlined_call_operand.vmem [shape: f32[1,2,128], index: 1, kind: input, shape index: {}]   ;;  %s370_s2 = inlined_call_operand.vmem [shape: f32[2,2,128], index: 2, kind: output, shape index: {}, may-alias: {0,2}]  }
   0x1   :  { %s335_s11 = smov 0  }
   0x2 LB: > { %s21_s12 = sadd.s32 1, %s333_s10  ;;  %p286_p0 = scmp.ge.s32.totalorder %s337_s11, 1  ;;  %s337_s11 = sphi %s335_s11, %s12_s11   ;;  %s333_s10 = sphi %s331_s10, %s332_s10   ;;  %s329_s9 = sphi %s354_s9, %s371_s9  }
   0x3   : > { %p22_p1 = scmp.ge.s32.totalorder %s21_s12, 2  ;;  %p139_p2 = scmp.lt.s32.totalorder %s337_s11, 3 }
   0x5   : > { %s373_s12 = smov (%p22_p1, %s21_s12), 0  ;;  %p140_p3 = pnand %p286_p0, %p139_p2 }
   0x6   : > { %p169_p4 = scmp.lt.s32.totalorder (!%p140_p3), %s329_s9, 1 }
   0x7   : > { %143 = sbr.rel (%p140_p3) target bundleno = 19 (0x13), region = 28 }
   0xc   : > { %s375_s9 = smov (!%p169_p4, %s329_s9), 1  ;;  %v188_v0 = vld [vmem:[%s369_s1] sm:$0x3] }
   0xd   : > { %s287_s13 = sshll.u32 %s375_s9, 1 }
   0xe   : > { %s175_s18 = scalar_lea.vmem %s368_s0, %s287_s13  ;;  %s186_s21 = scalar_lea.vmem %s370_s2, %s287_s13 }
   0xf   : > { %v187_v1 = vld [vmem:[%s175_s18] sm:$0x3] }
  0x10   : > { %v189_v2 = vadd.f32 %v188_v0, %v187_v1 }
  0x12   : > { %190 = vst [vmem:[%s186_s21] sm:$0x3] %v189_v2 }
  0x13 PF: > { %s12_s11 = sadd.s32 1, %s337_s11   ;;  %s371_s9 = smov %s333_s10 }
  0x14   : > { %p9_p5 = scmp.ge.s32.totalorder %s12_s11, 4   ;;  %s332_s10 = smov %s373_s12  }
  0x16   :  { %11 = sbr.rel (!%p9_p5) target bundleno = 2 (0x2), region = 61 }

</bundles_post_ra>
